<compile_context>
chip_gen: v5e
topology: v5e:2x2
jax: 0.10.0
libtpu: 0.0.40
codegen_flags: <defaults>
</compile_context>

<pallas_src>
import jax
import jax.numpy as jnp
from jax.experimental import pallas as pl
from jax.experimental.pallas import tpu as pltpu

_SUBLANE = 8           # vreg sublane width (second-to-last dim alignment)
_SPLIT_THRESHOLD = 1024  # above this batch, force >=2 grid tiles (v7x: 2 TCs)


def _round_up(n, m):
    return ((n + m - 1) // m) * m


def _qnet_kernel(x_ref, w1_ref, b1_ref, w2_ref, b2_ref, out_ref):
    """Fused Linear -> ReLU -> Linear on one batch tile.

    x_ref : (Bt, In)   f32 (cast to MXU dtype inside the kernel)
    w1_ref: (In, H)    MXU dtype (bf16 by default)
    b1_ref: (1,  H)    f32
    w2_ref: (H,  Out)  MXU dtype
    b2_ref: (1,  Out)  f32
    out   : (Bt, Out)  f32
    """
    # Cast x on the VPU here (hides under MXU/DMA slack) instead of a separate
    # XLA pass over x in HBM.
    x = x_ref[...].astype(w1_ref.dtype)
    # Layer 1: MXU matmul with f32 accumulation, bias + ReLU in f32 on the VPU
    # (f32 epilogue is correct on all generations; v5e has no bf16 VALU path).
    h = jnp.dot(x, w1_ref[...], preferred_element_type=jnp.float32)
    h = jnp.maximum(h + b1_ref[...], 0.0)
    h = h.astype(w2_ref.dtype)
    # Layer 2: MXU matmul with f32 accumulation, bias in f32.
    o = jnp.dot(h, w2_ref[...], preferred_element_type=jnp.float32)
    out_ref[...] = (o + b2_ref[...]).astype(out_ref.dtype)


def prepare_qnet_params(w1, b1, w2, b2, *, use_bf16=True):
    """One-time parameter preparation (hoisted out of the per-call forward).

    w1: [input_size, hidden_size]   b1: [hidden_size]
    w2: [hidden_size, output_size]  b2: [output_size]
    """
    dt = jnp.bfloat16 if use_bf16 else jnp.float32
    return (w1.astype(dt),
            b1.reshape(1, -1).astype(jnp.float32),
            w2.astype(dt),
            b2.reshape(1, -1).astype(jnp.float32))


def _choose_batch_tile(batch, batch_tile):
    bt = min(batch_tile, _round_up(batch, _SUBLANE))
    if batch > _SPLIT_THRESHOLD:
        # Keep >=2 grid tiles for large batches so v7x's second TensorCore
        # gets work (harmless / no-op on single-core v5e & v6e).
        bt = min(bt, _round_up((batch + 1) // 2, _SUBLANE))
    return max(_round_up(bt, _SUBLANE), _SUBLANE)


def linear_qnet_forward(x, params, *, batch_tile=2048):
    """Fused forward pass for Linear_QNet.

    x      : [B, input_size] (or [input_size] for single-state inference), f32
    params : output of prepare_qnet_params
    returns: [B, output_size] float32 (or [output_size] if x was 1-D)
    """
    w1k, b1_2d, w2k, b2_2d = params
    squeeze = x.ndim == 1
    if squeeze:
        x = x.reshape(1, -1)

    B, in_size = x.shape
    hidden = w1k.shape[1]
    out_size = w2k.shape[1]

    x = x.astype(jnp.float32)           # kernel casts to bf16 internally
    out_shape = jax.ShapeDtypeStruct((B, out_size), jnp.float32)

    bt = _choose_batch_tile(B, batch_tile)
    num_tiles = pl.cdiv(B, bt)

    if num_tiles == 1:
        # Small batch: single fully-resident call, no grid -> no per-step
        # pipeline prologue/epilogue.
        out = pl.pallas_call(
            _qnet_kernel,
            out_shape=out_shape,
        )(x, w1k, b1_2d, w2k, b2_2d)
    else:
        # Large batch: tile over rows with a possibly-ragged last block
        # (Pallas masks the partial stores).  Weights/biases use constant
        # index_maps so they stay VMEM-resident across grid steps.
        out = pl.pallas_call(
            _qnet_kernel,
            out_shape=out_shape,
            grid=(num_tiles,),
            in_specs=[
                pl.BlockSpec((bt, in_size), lambda i: (i, 0)),
                pl.BlockSpec((in_size, hidden), lambda i: (0, 0)),
                pl.BlockSpec((1, hidden), lambda i: (0, 0)),
                pl.BlockSpec((hidden, out_size), lambda i: (0, 0)),
                pl.BlockSpec((1, out_size), lambda i: (0, 0)),
            ],
            out_specs=pl.BlockSpec((bt, out_size), lambda i: (i, 0)),
            compiler_params=pltpu.CompilerParams(
                dimension_semantics=("parallel",)),
        )(x, w1k, b1_2d, w2k, b2_2d)

    return out[0] if squeeze else out


def reference_forward_f32(x, w1, b1, w2, b2):
    h = jnp.maximum(x @ w1 + b1, 0.0)
    return h @ w2 + b2


def reference_forward_mirrored(x, w1, b1, w2, b2, *, use_bf16=True):
    """Pure-JAX reference mirroring the kernel's bf16-in / f32-acc math."""
    dt = jnp.bfloat16 if use_bf16 else jnp.float32
    h = jnp.dot(x.astype(dt), w1.astype(dt),
                preferred_element_type=jnp.float32) + b1
    h = jnp.maximum(h, 0.0)
    return jnp.dot(h.astype(dt), w2.astype(dt),
                   preferred_element_type=jnp.float32) + b2


if __name__ == "__main__":
    # Module-implied small sizes: input_size=16, hidden=32, output=4.
    batch, input_size, hidden_size, output_size = 8, 16, 32, 4

    key = jax.random.PRNGKey(0)
    kx, kw1, kb1, kw2, kb2, kxb = jax.random.split(key, 6)

    x = jax.random.normal(kx, (batch, input_size), dtype=jnp.float32)
    # Init mimicking nn.Linear's uniform(-1/sqrt(fan_in), 1/sqrt(fan_in)).
    lim1 = 1.0 / (input_size ** 0.5)
    lim2 = 1.0 / (hidden_size ** 0.5)
    w1 = jax.random.uniform(kw1, (input_size, hidden_size), jnp.float32, -lim1, lim1)
    b1 = jax.random.uniform(kb1, (hidden_size,), jnp.float32, -lim1, lim1)
    w2 = jax.random.uniform(kw2, (hidden_size, output_size), jnp.float32, -lim2, lim2)
    b2 = jax.random.uniform(kb2, (output_size,), jnp.float32, -lim2, lim2)

    # One-time parameter prep (hoisted out of every forward).
    params = prepare_qnet_params(w1, b1, w2, b2)

    # --- small batch: no-grid, fully-resident path ---
    out = jax.block_until_ready(linear_qnet_forward(x, params))
    assert out.shape == (batch, output_size)
    ref_m = reference_forward_mirrored(x, w1, b1, w2, b2)
    ref_f = reference_forward_f32(x, w1, b1, w2, b2)
    assert jnp.allclose(out, ref_m, atol=2e-3, rtol=2e-3)
    assert jnp.allclose(out, ref_f, atol=5e-2, rtol=5e-2)  # bf16 input rounding

    # --- single-state (1-D) inference path, as used by the RL agent ---
    out1 = jax.block_until_ready(linear_qnet_forward(x[0], params))
    assert out1.shape == (output_size,)
    assert jnp.allclose(out1, ref_m[0], atol=2e-3, rtol=2e-3)

    # --- large ragged batch: tiled path, ragged last block masked by Pallas ---
    big_batch = 1500
    xb = jax.random.normal(kxb, (big_batch, input_size), dtype=jnp.float32)
    out_b = jax.block_until_ready(
        linear_qnet_forward(xb, params, batch_tile=512))
    assert out_b.shape == (big_batch, output_size)
    ref_b = reference_forward_mirrored(xb, w1, b1, w2, b2)
    assert jnp.allclose(out_b, ref_b, atol=2e-3, rtol=2e-3)

    # TODO(synk): save()/load() do host-side file I/O of the state_dict; no
    # Pallas equivalent (handled outside the kernel).
    print("KERNEL_OK")
</pallas_src>

<mosaic_0001>
module attributes {stable_mosaic.version = 11 : i64} {
  func.func @_qnet_kernel(%arg0: memref<8x16xf32, #tpu.memory_space<vmem>>, %arg1: memref<16x32xbf16, #tpu.memory_space<vmem>>, %arg2: memref<1x32xf32, #tpu.memory_space<vmem>>, %arg3: memref<32x4xbf16, #tpu.memory_space<vmem>>, %arg4: memref<1x4xf32, #tpu.memory_space<vmem>>, %arg5: memref<8x4xf32, #tpu.memory_space<vmem>>) attributes {dimension_semantics = [], scalar_prefetch = 0 : i64, scratch_operands = 0 : i64, tpu.core_type = #tpu.core_type<tc>} {
    %c0 = arith.constant 0 : index
    %c0_0 = arith.constant 0 : index
    %0 = vector.load %arg0[%c0, %c0_0] : memref<8x16xf32, #tpu.memory_space<vmem>>, vector<8x16xf32>
    %1 = arith.truncf %0 : vector<8x16xf32> to vector<8x16xbf16>
    %c0_1 = arith.constant 0 : index
    %c0_2 = arith.constant 0 : index
    %2 = vector.load %arg1[%c0_1, %c0_2] : memref<16x32xbf16, #tpu.memory_space<vmem>>, vector<16x32xbf16>
    %cst = arith.constant dense<0.000000e+00> : vector<8x32xf32>
    %3 = tpu.matmul %1, %2, %cst {dimension_numbers = #tpu.dot_dimension_numbers<[1], [0], [0], [1], [0, 0, 1, 1], [], []>} : vector<8x16xbf16>, vector<16x32xbf16>, vector<8x32xf32> -> vector<8x32xf32>
    %c0_3 = arith.constant 0 : index
    %c0_4 = arith.constant 0 : index
    %4 = vector.load %arg2[%c0_3, %c0_4] : memref<1x32xf32, #tpu.memory_space<vmem>>, vector<1x32xf32>
    %5 = vector.broadcast %4 : vector<1x32xf32> to vector<8x32xf32>
    %6 = arith.addf %3, %5 : vector<8x32xf32>
    %cst_5 = arith.constant 0.000000e+00 : f32
    %7 = vector.broadcast %cst_5 : f32 to vector<8x32xf32>
    %8 = arith.maximumf %6, %7 : vector<8x32xf32>
    %9 = arith.truncf %8 : vector<8x32xf32> to vector<8x32xbf16>
    %c0_6 = arith.constant 0 : index
    %c0_7 = arith.constant 0 : index
    %10 = vector.load %arg3[%c0_6, %c0_7] : memref<32x4xbf16, #tpu.memory_space<vmem>>, vector<32x4xbf16>
    %cst_8 = arith.constant dense<0.000000e+00> : vector<8x4xf32>
    %11 = tpu.matmul %9, %10, %cst_8 {dimension_numbers = #tpu.dot_dimension_numbers<[1], [0], [0], [1], [0, 0, 1, 1], [], []>} : vector<8x32xbf16>, vector<32x4xbf16>, vector<8x4xf32> -> vector<8x4xf32>
    %c0_9 = arith.constant 0 : index
    %c0_10 = arith.constant 0 : index
    %12 = vector.load %arg4[%c0_9, %c0_10] : memref<1x4xf32, #tpu.memory_space<vmem>>, vector<1x4xf32>
    %13 = vector.broadcast %12 : vector<1x4xf32> to vector<8x4xf32>
    %14 = arith.addf %11, %13 : vector<8x4xf32>
    %c0_11 = arith.constant 0 : index
    %c0_12 = arith.constant 0 : index
    %15 = vector.load %arg5[%c0_11, %c0_12] : memref<8x4xf32, #tpu.memory_space<vmem>>, vector<8x4xf32>
    tpu.vector_store %arg5[%c0_11, %c0_12], %14 {strides = array<i32>} : memref<8x4xf32, #tpu.memory_space<vmem>>, vector<8x4xf32>,
    return
  }
}

</mosaic_0001>

<bundles_post_ra>
// kernel: tpu_custom_call.1
= control target key start
LH: loop header
LB: loop body
LE: loop exit
PB: predicated region body
PF: predicated region fallthrough
CT: control target
= control target key end

     0   :  { %vm35_vm0 = vcmask 130048   ;;  %vm74_vm1 = vcmask 261120   ;;  %vm91_vm2 = vcmask 31744   ;;  %s167_s1 = inlined_call_operand.vmem [shape: bf16[16,32], index: 1, kind: input, shape index: {}]   ;;  %s168_s0 = inlined_call_operand.vmem [shape: f32[8,16], index: 0, kind: input, shape index: {}]   ;;  %s169_s2 = inlined_call_operand.vmem [shape: f32[1,32], index: 2, kind: input, shape index: {}]   ;;  %s170_s4 = inlined_call_operand.vmem [shape: f32[1,4], index: 4, kind: input, shape index: {}]   ;;  %s171_s3 = inlined_call_operand.vmem [shape: bf16[32,4], index: 3, kind: input, shape index: {}]   ;;  %s172_s5 = inlined_call_operand.vmem [shape: f32[8,4], index: 5, kind: output, shape index: {}]  }
   0x1   :  { %v111_v0 = vld [vmem:[%s167_s1] sm:$0xff]  ;;  %v113_v3 = vld [vmem:[%s171_s3 + $0x8] sm:$0xff] }
   0x2   :  { %v21_v1 = vld [vmem:[%s168_s0] sm:$0xff]  ;;  %46 = vmatpush.bf16.msra.mxu0 %v111_v0  ;;  %84 = vmatpush.bf16.msra.mxu1 %v113_v3 }
   0x3   :  { %v22_v2 = vpack.c.bf16 %v21_v1, %v21_v1  ;;  %v112_v4 = vld [vmem:[%s171_s3] sm:$0xff] }
   0x4   :  { %v114_v5 = vld [vmem:[%s169_s2] ss:$0 sm:$0xff] }
   0x5   :  { %101 = vmatmul.msk.bf16.vlgmr.msra.gmra.mxu0 %vm35_vm0, %v22_v2  ;;  %v115_v11 = vld [vmem:[%s170_s4] ss:$0 sm:$0xff] }
   0x6   :  { %85 = vmatpush.bf16.msra.mxu1 %v112_v4 }
  0x82   :  { %v48_v6 = vpop.f32.mrf.mxu0 }
  0x83   :  { %v49_v7 = vadd.f32 %v114_v5, %v48_v6 }
  0x85   :  { %v52_v8 = vmax.f32 %v49_v7, 0.0 }
  0x87   :  { %v53_v9 = vpack.c.bf16 %v52_v8, %v52_v8 }
  0x89   :  { %110 = vmatmul.msk.bf16.vlgmr.msra.gmra.mxu1 %vm74_vm1, %v53_v9 }
  0x8a   :  { %v50_v10 = vpop.f32.mrf.mxu0 }
 0x106   :  { %v87_v12 = vpop.f32.mrf.mxu1 }
 0x107   :  { %v88_v13 = vadd.f32 %v115_v11, %v87_v12 }
 0x109   :  { %92 = vst.msk [vmem:[%s172_s5] sm:$0xff] %vm91_vm2, %v88_v13 }
 0x10e   :  { %v89_v14 = vpop.f32.mrf.mxu1 }

</bundles_post_ra>
